<compile_context>
chip_gen: v7x
topology: tpu7x:2x2x1
jax: 0.10.0
libtpu: 0.0.40
codegen_flags: <defaults>
</compile_context>

<pallas_src>
import numpy as np
import jax
import jax.numpy as jnp
from jax.experimental import pallas as pl
from jax.experimental.pallas import tpu as pltpu


# ---------------------------------------------------------------------------
# Operator-matrix builders (plain numpy glue; exact PyTorch semantics)
# ---------------------------------------------------------------------------
def adaptive_avg_pool_matrix(in_size: int, out_size: int) -> np.ndarray:
    """A (out_size, in_size) matrix s.t. A @ v == AdaptiveAvgPool1d(v)."""
    A = np.zeros((out_size, in_size), dtype=np.float32)
    for i in range(out_size):
        s = (i * in_size) // out_size
        e = -((-(i + 1) * in_size) // out_size)  # ceil((i+1)*in/out)
        A[i, s:e] = 1.0 / float(e - s)
    return A


def bilinear_upsample_matrix(out_size: int, in_size: int) -> np.ndarray:
    """U (out_size, in_size) s.t. U @ v == F.interpolate(v, mode='linear',
    align_corners=False) along one axis (PyTorch source-index convention)."""
    U = np.zeros((out_size, in_size), dtype=np.float32)
    if in_size == 1:
        U[:, 0] = 1.0
        return U
    scale = in_size / out_size
    for o in range(out_size):
        src = (o + 0.5) * scale - 0.5
        if src < 0.0:
            src = 0.0
        i0 = int(np.floor(src))
        if i0 > in_size - 1:
            i0 = in_size - 1
        i1 = min(i0 + 1, in_size - 1)
        frac = src - i0
        U[o, i0] += 1.0 - frac
        U[o, i1] += frac
    return U


# ---------------------------------------------------------------------------
# Pallas kernel: single program, batch folded into the matmul M dimension.
# ---------------------------------------------------------------------------
def pyramid_pool_kernel(x_ref, aat_ref, wblk_ref, uut_ref, o_ref):
    # fused 2-D adaptive avg pool: (N*(C+1), HW) @ (HW, PP) -> (N*(C+1), PP)
    pooled = jnp.dot(x_ref[...], aat_ref[...], preferred_element_type=jnp.float32)
    # 1x1 conv with BN scale+bias folded (block-diag over batch) + ReLU:
    # (N*Cout, N*(C+1)) @ (N*(C+1), PP) -> (N*Cout, PP)
    y = jnp.maximum(
        jnp.dot(wblk_ref[...], pooled, preferred_element_type=jnp.float32), 0.0)
    # fused 2-D bilinear upsample: (N*Cout, PP) @ (PP, HW) -> (N*Cout, HW)  lane-dense
    o_ref[...] = jnp.dot(y, uut_ref[...],
                         preferred_element_type=jnp.float32).astype(o_ref.dtype)


def pyramid_pool_forward(x, conv_w, bn_scale, bn_bias, pool_size):
    """x: (N, C, H, W) f32; conv_w: (Cout, C); bn_scale/bn_bias: (Cout,)."""
    N, C, H, W = x.shape
    Cout = conv_w.shape[0]
    Ph = Pw = int(pool_size)
    HW = H * W
    PP = Ph * Pw
    C1 = C + 1            # extra all-ones channel carries the BN bias through the conv

    A_h = adaptive_avg_pool_matrix(H, Ph)          # (Ph, H)
    A_w = adaptive_avg_pool_matrix(W, Pw)          # (Pw, W)
    U_h = bilinear_upsample_matrix(H, Ph)          # (H, Ph)
    U_w = bilinear_upsample_matrix(W, Pw)          # (W, Pw)

    # vec-kron operators: pool / upsample over both spatial axes as one matmul each.
    aat = jnp.asarray(np.kron(A_h, A_w).T)         # (HW, PP)
    uut = jnp.asarray(np.kron(U_h, U_w).T)         # (PP, HW)

    # Fold BN scale into the conv weight and BN bias into an extra weight column;
    # replicate block-diagonally over the batch so the shared conv is one matmul.
    wsc = conv_w.astype(jnp.float32) * bn_scale.astype(jnp.float32)[:, None]      # (Cout, C)
    w_ext = jnp.concatenate([wsc, bn_bias.astype(jnp.float32)[:, None]], axis=1)  # (Cout, C+1)
    wblk = jnp.kron(jnp.eye(N, dtype=jnp.float32), w_ext)                         # (N*Cout, N*C1)

    # Append the all-ones channel (pools to 1.0) and flatten batch into M.
    x2 = x.reshape(N, C, HW).astype(jnp.float32)
    x_ext = jnp.concatenate([x2, jnp.ones((N, 1, HW), jnp.float32)], axis=1)       # (N, C1, HW)
    x_ext = x_ext.reshape(N * C1, HW)

    flops = 2 * ((N * C1) * HW * PP + (N * Cout) * (N * C1) * PP + (N * Cout) * PP * HW)
    bytes_accessed = 4 * ((N * C1) * HW + HW * PP + (N * Cout) * (N * C1)
                          + PP * HW + (N * Cout) * HW)

    out2 = pl.pallas_call(
        pyramid_pool_kernel,
        out_shape=jax.ShapeDtypeStruct((N * Cout, HW), x.dtype),
        grid=(1,),
        in_specs=[
            pl.BlockSpec((N * C1, HW), lambda i: (0, 0)),
            pl.BlockSpec((HW, PP), lambda i: (0, 0)),
            pl.BlockSpec((N * Cout, N * C1), lambda i: (0, 0)),
            pl.BlockSpec((PP, HW), lambda i: (0, 0)),
        ],
        out_specs=pl.BlockSpec((N * Cout, HW), lambda i: (0, 0)),
        compiler_params=pltpu.CompilerParams(dimension_semantics=("arbitrary",)),
        cost_estimate=pl.CostEstimate(flops=flops, transcendentals=0,
                                      bytes_accessed=bytes_accessed),
    )(x_ext, aat, wblk, uut)

    return out2.reshape(N, Cout, H, W)


if __name__ == "__main__":
    # Small shapes consistent with PyramidPool(in_channel=4, out_channel=8, pool_size=3)
    N, C, H, W = 2, 4, 16, 16
    Cout, pool_size = 8, 3

    key = jax.random.PRNGKey(0)
    k1, k2, k3, k4 = jax.random.split(key, 4)
    x = jax.random.normal(k1, (N, C, H, W), dtype=jnp.float32)
    conv_w = 0.1 * jax.random.normal(k2, (Cout, C), dtype=jnp.float32)   # Conv2d 1x1, no bias
    gamma = 1.0 + 0.1 * jax.random.normal(k3, (Cout,), dtype=jnp.float32)
    beta = 0.1 * jax.random.normal(k4, (Cout,), dtype=jnp.float32)
    running_mean = jnp.zeros((Cout,), jnp.float32)
    running_var = jnp.ones((Cout,), jnp.float32)
    eps = 1e-5
    bn_scale = gamma / jnp.sqrt(running_var + eps)
    bn_bias = beta - running_mean * bn_scale

    out = pyramid_pool_forward(x, conv_w, bn_scale, bn_bias, pool_size)
    out = jax.block_until_ready(out)

    # Pure-JAX reference (same math, outside Pallas) for a sanity check.
    A_h = jnp.asarray(adaptive_avg_pool_matrix(H, pool_size))
    A_w = jnp.asarray(adaptive_avg_pool_matrix(W, pool_size))
    U_h = jnp.asarray(bilinear_upsample_matrix(H, pool_size))
    U_w = jnp.asarray(bilinear_upsample_matrix(W, pool_size))
    pooled = jnp.einsum('ph,nchw,qw->ncpq', A_h, x, A_w)
    y = jnp.einsum('oc,ncpq->nopq', conv_w, pooled)
    y = jnp.maximum(y * bn_scale[None, :, None, None] + bn_bias[None, :, None, None], 0.0)
    ref = jnp.einsum('hp,nopq,wq->nohw', U_h, y, U_w)

    assert out.shape == (N, Cout, H, W)
    assert jnp.allclose(out, ref, rtol=1e-4, atol=1e-4), "mismatch vs reference"
    print("KERNEL_OK")
</pallas_src>

<mosaic_0001>
module attributes {stable_mosaic.version = 11 : i64} {
  func.func @pyramid_pool_kernel(%arg0: i32, %arg1: memref<10x256xf32, #tpu.memory_space<vmem>>, %arg2: memref<256x9xf32, #tpu.memory_space<vmem>>, %arg3: memref<16x10xf32, #tpu.memory_space<vmem>>, %arg4: memref<9x256xf32, #tpu.memory_space<vmem>>, %arg5: memref<16x256xf32, #tpu.memory_space<vmem>>) attributes {dimension_semantics = [#tpu.dimension_semantics<arbitrary>], iteration_bounds = array<i64: 1>, scalar_prefetch = 0 : i64, scratch_operands = 0 : i64, tpu.core_type = #tpu.core_type<tc>, window_params = [{pipeline_mode = #tpu.pipeline_mode<synchronous>, transform_indices = @transform_0, window_bounds = array<i64: 10, 256>}, {pipeline_mode = #tpu.pipeline_mode<synchronous>, transform_indices = @transform_1, window_bounds = array<i64: 256, 9>}, {pipeline_mode = #tpu.pipeline_mode<synchronous>, transform_indices = @transform_2, window_bounds = array<i64: 16, 10>}, {pipeline_mode = #tpu.pipeline_mode<synchronous>, transform_indices = @transform_3, window_bounds = array<i64: 9, 256>}, {pipeline_mode = #tpu.pipeline_mode<synchronous>, transform_indices = @transform_4, window_bounds = array<i64: 16, 256>}]} {
    %c0 = arith.constant 0 : index
    %c0_0 = arith.constant 0 : index
    %0 = vector.load %arg1[%c0, %c0_0] : memref<10x256xf32, #tpu.memory_space<vmem>>, vector<10x256xf32>
    %c0_1 = arith.constant 0 : index
    %c0_2 = arith.constant 0 : index
    %1 = vector.load %arg2[%c0_1, %c0_2] : memref<256x9xf32, #tpu.memory_space<vmem>>, vector<256x9xf32>
    %cst = arith.constant dense<0.000000e+00> : vector<10x9xf32>
    %2 = tpu.matmul %0, %1, %cst {dimension_numbers = #tpu.dot_dimension_numbers<[1], [0], [0], [1], [0, 0, 1, 1], [], []>} : vector<10x256xf32>, vector<256x9xf32>, vector<10x9xf32> -> vector<10x9xf32>
    %c0_3 = arith.constant 0 : index
    %c0_4 = arith.constant 0 : index
    %3 = vector.load %arg3[%c0_3, %c0_4] : memref<16x10xf32, #tpu.memory_space<vmem>>, vector<16x10xf32>
    %cst_5 = arith.constant dense<0.000000e+00> : vector<16x9xf32>
    %4 = tpu.matmul %3, %2, %cst_5 {dimension_numbers = #tpu.dot_dimension_numbers<[1], [0], [0], [1], [0, 0, 1, 1], [], []>} : vector<16x10xf32>, vector<10x9xf32>, vector<16x9xf32> -> vector<16x9xf32>
    %cst_6 = arith.constant 0.000000e+00 : f32
    %5 = vector.broadcast %cst_6 : f32 to vector<16x9xf32>
    %6 = arith.maximumf %4, %5 : vector<16x9xf32>
    %c0_7 = arith.constant 0 : index
    %c0_8 = arith.constant 0 : index
    %7 = vector.load %arg4[%c0_7, %c0_8] : memref<9x256xf32, #tpu.memory_space<vmem>>, vector<9x256xf32>
    %cst_9 = arith.constant dense<0.000000e+00> : vector<16x256xf32>
    %8 = tpu.matmul %6, %7, %cst_9 {dimension_numbers = #tpu.dot_dimension_numbers<[1], [0], [0], [1], [0, 0, 1, 1], [], []>} : vector<16x9xf32>, vector<9x256xf32>, vector<16x256xf32> -> vector<16x256xf32>
    %c0_10 = arith.constant 0 : index
    %c0_11 = arith.constant 0 : index
    %9 = vector.load %arg5[%c0_10, %c0_11] : memref<16x256xf32, #tpu.memory_space<vmem>>, vector<16x256xf32>
    tpu.vector_store %arg5[%c0_10, %c0_11], %8 {strides = array<i32>} : memref<16x256xf32, #tpu.memory_space<vmem>>, vector<16x256xf32>,
    return
  }
  func.func @transform_0(%arg0: i32) -> (i32, i32) {
    %c0_i32 = arith.constant 0 : i32
    %c0_i32_0 = arith.constant 0 : i32
    %c0_i32_1 = arith.constant 0 : i32
    return %c0_i32, %c0_i32_0 : i32, i32
  }
  func.func @transform_1(%arg0: i32) -> (i32, i32) {
    %c0_i32 = arith.constant 0 : i32
    %c0_i32_0 = arith.constant 0 : i32
    %c0_i32_1 = arith.constant 0 : i32
    return %c0_i32, %c0_i32_0 : i32, i32
  }
  func.func @transform_2(%arg0: i32) -> (i32, i32) {
    %c0_i32 = arith.constant 0 : i32
    %c0_i32_0 = arith.constant 0 : i32
    %c0_i32_1 = arith.constant 0 : i32
    return %c0_i32, %c0_i32_0 : i32, i32
  }
  func.func @transform_3(%arg0: i32) -> (i32, i32) {
    %c0_i32 = arith.constant 0 : i32
    %c0_i32_0 = arith.constant 0 : i32
    %c0_i32_1 = arith.constant 0 : i32
    return %c0_i32, %c0_i32_0 : i32, i32
  }
  func.func @transform_4(%arg0: i32) -> (i32, i32) {
    %c0_i32 = arith.constant 0 : i32
    %c0_i32_0 = arith.constant 0 : i32
    %c0_i32_1 = arith.constant 0 : i32
    return %c0_i32, %c0_i32_0 : i32, i32
  }
}

</mosaic_0001>

<bundles_post_ra>
// kernel: tpu_custom_call.1
= control target key start
LH: loop header
LB: loop body
LE: loop exit
PB: predicated region body
PF: predicated region fallthrough
CT: control target
= control target key end

     0   :  { %s633_s0 = inlined_call_operand.vmem [shape: f32[10,256], index: 0, kind: input, shape index: {}]   ;;  %s634_s1 = inlined_call_operand.vmem [shape: f32[256,9], index: 1, kind: input, shape index: {}]   ;;  %s635_s2 = inlined_call_operand.vmem [shape: f32[16,10], index: 2, kind: input, shape index: {}]   ;;  %s636_s3 = inlined_call_operand.vmem [shape: f32[9,256], index: 3, kind: input, shape index: {}]   ;;  %s637_s4 = inlined_call_operand.hbm [shape: f32[16,256], index: 4, kind: output, shape index: {}]  }
   0x1   :  { %v38_v0 = vld [vmem:[%s634_s1 + $0x80] sm:$0xff]  ;;  %v39_v1 = vld [vmem:[%s634_s1 + $0x88] sm:$0xff]  ;;  %v40_v5 = vld [vmem:[%s634_s1 + $0x90] sm:$0xff] }
   0x2   :  { %v22_v2 = vld [vmem:[%s634_s1] sm:$0xff]  ;;  %v390_v3 = vpack.c.bf16 %v39_v1, %v38_v0  ;;  %v23_v4 = vld [vmem:[%s634_s1 + $0x8] sm:$0xff]  ;;  %v41_v6 = vld [vmem:[%s634_s1 + $0x98] sm:$0xff] }
   0x3   :  { %v392_v7 = vpack.c.bf16 %v23_v4, %v22_v2  ;;  %v394_v8 = vpack.c.bf16 %v41_v6, %v40_v5  ;;  %v24_v9 = vld [vmem:[%s634_s1 + $0x10] sm:$0xff]  ;;  %v25_v10 = vld [vmem:[%s634_s1 + $0x18] sm:$0xff]  ;;  %v42_v11 = vld [vmem:[%s634_s1 + $0xa0] sm:$0xff] }
   0x4   :  { %391 = vmatprep.subr.bf16.mxu0 %v390_v3  ;;  %v43_v12 = vld [vmem:[%s634_s1 + $0xa8] sm:$0xff]  ;;  %v396_v13 = vpack.c.bf16 %v25_v10, %v24_v9  ;;  %v26_v15 = vld [vmem:[%s634_s1 + $0x20] sm:$0xff]  ;;  %v44_v17 = vld [vmem:[%s634_s1 + $0xb0] sm:$0xff] }
   0x5   :  { %393 = vmatpush3.bf16.msra.mxu0 %v392_v7  ;;  %v398_v14 = vpack.c.bf16 %v43_v12, %v42_v11  ;;  %v27_v16 = vld [vmem:[%s634_s1 + $0x28] sm:$0xff]  ;;  %v45_v18 = vld [vmem:[%s634_s1 + $0xb8] sm:$0xff]  ;;  %v28_v21 = vld [vmem:[%s634_s1 + $0x30] sm:$0xff] }
   0x6   :  { %395 = vmatprep.subr.bf16.mxu0 %v394_v8  ;;  %v400_v19 = vpack.c.bf16 %v27_v16, %v26_v15  ;;  %v402_v20 = vpack.c.bf16 %v45_v18, %v44_v17  ;;  %v29_v22 = vld [vmem:[%s634_s1 + $0x38] sm:$0xff]  ;;  %v46_v23 = vld [vmem:[%s634_s1 + $0xc0] sm:$0xff]  ;;  %v47_v24 = vld [vmem:[%s634_s1 + $0xc8] sm:$0xff] }
   0x7   :  { %v19_v25 = vld [vmem:[%s633_s0 + $0x8] sm:$0xff]  ;;  %v404_v26 = vpack.c.bf16 %v29_v22, %v28_v21 }
   0x8   :  { %118 = vmatprep.mubr.f32.mxu0 %v19_v25 }
   0x9   :  { %397 = vmatpush3.bf16.msra.mxu0 %v396_v13 }
   0xa   :  { %399 = vmatprep.subr.bf16.mxu0 %v398_v14 }
   0xd   :  { %401 = vmatpush3.bf16.msra.mxu0 %v400_v19 }
   0xe   :  { %9 = vsyncpa [#allocation3], 0  ;;  %403 = vmatprep.subr.bf16.mxu0 %v402_v20  ;;  %v406_v27 = vpack.c.bf16 %v47_v24, %v46_v23  ;;  %v30_v28 = vld [vmem:[%s634_s1 + $0x40] sm:$0xff]  ;;  %v31_v29 = vld [vmem:[%s634_s1 + $0x48] sm:$0xff]  ;;  %vm131_vm0 = vcmask 80896   ;;  %vm138_vm1 = vcmask 1041408  }
   0xf   :  { %v48_v30 = vld [vmem:[%s634_s1 + $0xd0] sm:$0xff]  ;;  %v49_v31 = vld [vmem:[%s634_s1 + $0xd8] sm:$0xff]  ;;  %v408_v32 = vpack.c.bf16 %v31_v29, %v30_v28  ;;  %v50_v36 = vld [vmem:[%s634_s1 + $0xe0] sm:$0xff]  ;;  %vm230_vm2 = vcmask 1040384   ;;  %vm463_vm3 = vmmov 1   ;;  %v464_v3 = vmov 0.0  }
  0x10   :  { %v410_v33 = vpack.c.bf16 %v49_v31, %v48_v30  ;;  %v32_v34 = vld [vmem:[%s634_s1 + $0x50] sm:$0xff]  ;;  %v33_v35 = vld [vmem:[%s634_s1 + $0x58] sm:$0xff]  ;;  %v51_v37 = vld [vmem:[%s634_s1 + $0xe8] sm:$0xff]  ;;  %vm223_vm6 = vcmask 72704  }
  0x11   :  { %405 = vmatpush3.bf16.msra.mxu0 %v404_v26  ;;  %v412_v38 = vpack.c.bf16 %v33_v35, %v32_v34  ;;  %v414_v39 = vpack.c.bf16 %v51_v37, %v50_v36  ;;  %v34_v40 = vld [vmem:[%s634_s1 + $0x60] sm:$0xff]  ;;  %v35_v41 = vld [vmem:[%s634_s1 + $0x68] sm:$0xff]  ;;  %v52_v42 = vld [vmem:[%s634_s1 + $0xf0] sm:$0xff] }
  0x12   :  { %407 = vmatprep.subr.bf16.mxu0 %v406_v27  ;;  %v53_v43 = vld [vmem:[%s634_s1 + $0xf8] sm:$0xff]  ;;  %v416_v44 = vpack.c.bf16 %v35_v41, %v34_v40  ;;  %v36_v46 = vld [vmem:[%s634_s1 + $0x70] sm:$0xff]  ;;  %v18_v49 = vld [vmem:[%s633_s0] sm:$0xff] }
  0x13   :  { %v418_v45 = vpack.c.bf16 %v53_v43, %v52_v42  ;;  %v37_v47 = vld [vmem:[%s634_s1 + $0x78] sm:$0xff]  ;;  %v20_v51 = vld [vmem:[%s633_s0 + $0x10] sm:$0x3]  ;;  %v129_v52 = vld [vmem:[%s635_s2] sm:$0xff] }
  0x14   :  { %v420_v48 = vpack.c.bf16 %v37_v47, %v36_v46  ;;  %v21_v50 = vld [vmem:[%s633_s0 + $0x18] sm:$0x3]  ;;  %387 = vmatprep.mubr.msk.f32.mxu1 %vm131_vm0, %v129_v52  ;;  %v220_v58 = vld [vmem:[%s636_s3 + $0x8] sm:$0xff]  ;;  %vm423_vm4 = vmpackc.low %vm138_vm1, %vm463_vm3 }
  0x15   :  { %409 = vmatpush3.bf16.msra.mxu0 %v408_v32  ;;  %v222_v59 = vld [vmem:[%s636_s3 + $0x18] sm:$0x1]  ;;  %vm429_vm5 = vmpackc.low %vm230_vm2, %vm463_vm3  ;;  %v130_v63 = vld [vmem:[%s635_s2 + $0x8] sm:$0xff]  ;;  %s465_s2 = smov [#allocation2]  }
  0x16   :  { %411 = vmatprep.subr.bf16.mxu0 %v410_v33  ;;  %v428_v62 = vpack.c.bf16 %v222_v59, %v220_v58  ;;  %v219_v0 = vld [vmem:[%s636_s3] sm:$0xff]  ;;  %v221_v1 = vld [vmem:[%s636_s3 + $0x10] sm:$0x1]  ;;  %s323_s19 = sshll.u32 %s465_s2, 4  ;;  %s324_s19 = int_to_ptr.vmem [resolvable:$true] %s323_s19 }
  0x17   :  { %v431_v2 = vpack.c.bf16 %v221_v1, %v219_v0  ;;  %s439_s3 = scalar_lea.vmem %s324_s19, 512  ;;  %p444_p1 = scmp.lt.s32.totalorder %s324_s19, %s324_s19 }
  0x18   :  { %p440_p0 = scmp.ne.s32.totalorder %s324_s19, %s439_s3  ;;  %p445_p2 = scmp.lt.s32.totalorder %s439_s3, %s439_s3 }
  0x19   :  { %413 = vmatpush3.bf16.msra.mxu0 %v412_v38 }
  0x1a   :  { %415 = vmatprep.subr.bf16.mxu0 %v414_v39  ;;  %p446_p3 = por %p445_p2, %p444_p1 }
  0x1c   :  { %p447_p4 = pnand %p446_p3, %p440_p0 }
  0x1d   :  { %417 = vmatpush3.bf16.msra.mxu0 %v416_v44 }
  0x1e   :  { %419 = vmatprep.subr.bf16.mxu0 %v418_v45 }
  0x21   :  { %421 = vmatpush3.bf16.msra.mxu0 %v420_v48 }
  0x24   :  { %119 = vmatmul.mubr.f32.vlgmr.msra.gmra.mrb[0].mxu0 %v18_v49 }
  0x25   :  { %123 = vmatprep.mubr.f32.mxu0 %v21_v50 }
  0x28   :  { %124 = vmatmul.mubr.f32.gmra.mrb[2].mxu0 %v20_v51 }
  0xf7   :  { %v373_v53 = vpop.f32.mrb[0].mxu0 }
  0xf8   :  { %v374_v54 = vpop.f32.mrb[1].mxu0 }
  0xf9   :  { %v375_v55 = vadd.f32 %v374_v54, %v373_v53 }
  0xfb   :  { %v376_v56 = vpop.f32.mrb[2].mxu0 }
  0xfc   :  { %v377_v57 = vpop.f32.mrb[3].mxu0 }
  0xfd   :  { %v378_v60 = vadd.f32 %v377_v57, %v376_v56 }
  0xff   :  { %v422_v61 = vpack.c.bf16 %v378_v60, %v375_v55 }
 0x101   :  { %424 = vmatprep.subr.msk.bf16.mxu1 %vm423_vm4, %v422_v61 }
 0x102   :  { %427 = vmatpush3.bf16.msk.msra.mxu1 %vm423_vm4, %v422_v61 }
 0x103   :  { %430 = vmatprep.subr.msk.bf16.mxu1 %vm429_vm5, %v428_v62 }
 0x105   :  { %388 = vmatmul.mubr.msk.f32.vlgmr.msra.gmra.mrb[0].mxu1 %vm131_vm0, %v130_v63 }
 0x106   :  { %433 = vmatpush1.bf16.msk.msra.mxu1 %vm429_vm5, %v431_v2  ;;  %301 = vmatprep.mubr.f32.mxu1 %v464_v3 }
 0x1d8   :  { %v389_v4 = vpop.f32.mrb[0].mxu1 }
 0x1d9   :  { %v208_v5 = vpop.f32.mrb[1].mxu1  ;;  %v218_v7 = vmax.f32 %v389_v4, 0.0 }
 0x1da   :  { %v217_v6 = vmax.f32 %v208_v5, 0.0 }
 0x1dc   :  { %339 = vmatmul.mubr.msk.f32.vlgmr.msra.gmra.mrb[2].mxu1 %vm223_vm6, %v217_v6 }
 0x1dd   :  { %307 = vmatprep.mubr.f32.mxu1 %v464_v3 }
 0x1e0   :  { %340 = vmatmul.mubr.msk.f32.gmra.mrb[4].mxu1 %vm223_vm6, %v218_v7 }
 0x2af   :  { %v303_v8 = vpop.f32.mrb[2].mxu1 }
 0x2b0   :  { %314 = vst [vmem:[#allocation2] sm:$0xff] %v303_v8  ;;  %v305_v9 = vpop.f32.mrb[3].mxu1 }
 0x2b1   :  { %315 = vst [vmem:[#allocation2 + $0x8] sm:$0xff] %v305_v9 }
 0x2b3   :  { %v309_v10 = vpop.f32.mrb[4].mxu1 }
 0x2b4   :  { %316 = vst [vmem:[#allocation2 + $0x10] sm:$0xff] %v309_v10  ;;  %v311_v11 = vpop.f32.mrb[5].mxu1 }
 0x2b5   :  { %317 = vst [vmem:[#allocation2 + $0x18] sm:$0xff] %v311_v11 }
 0x2b6   :  { %450 = shalt.err (!%p447_p4)
}
 0x2b7   :  { %s451_s22 = scalar_lea.hbm %s637_s4, 512 }
 0x2b8   :  { %p452_p5 = scmp.ne.s32.totalorder %s637_s4, %s451_s22  ;;  %p455_p6 = scmp.lt.u32.totalorder %s451_s22, %s637_s4 }
 0x2ba   :  { %p457_p7 = pnand %p455_p6, %p452_p5 }
 0x2bc   :  { %460 = shalt.err (!%p457_p7)
}
 0x2bd   :  { %s466_s27 = smov 256   ;;  %s467_s28 = smov 16  }
 0x2be   :  { %329 = dma.vmem_to_hbm [thread:$0]  %s324_s19, 512, %s637_s4, [#allocation3], %s466_s27, %s466_s27, %s467_s28  }
 0x2bf   :  { %461 = dma.done.wait [#allocation3], 512  }
 0x2c0   :  { %462 = vsyncadd [#allocation3], 4294966784 }
 0x2c1   :  { %333 = vsyncpa [#allocation3], 1 }

</bundles_post_ra>
